<compile_context>
chip_gen: v6e
topology: v6e:2x2x1
jax: 0.10.0
libtpu: 0.0.40
codegen_flags: <defaults>
</compile_context>

<pallas_src>
import jax
import jax.numpy as jnp
from jax import lax
from jax.experimental import pallas as pl
from jax.experimental.pallas import tpu as pltpu

LANE = 128  # lane width: classifier output padded to this for unmasked stores


# ---------------------------------------------------------------------------
# Pallas kernel: fused cross-attention interaction + classifier, one batch
# element per grid step.
#   scores_ph = bmm(tanh(bmm(u, W1)), v^T); P = softmax(scores_ph^T); att_v = P @ u
#   scores_hp = bmm(tanh(bmm(v, W2)), u^T); Q = softmax(scores_hp^T); att_u = Q @ v
#   logits_x  = [x, a, x-a, x*a] @ W_cls + b_cls       (Dropout(0.2) = identity)
# NOTE: like the PyTorch reference, attention masks are NOT applied to the
#       interaction softmax (they only feed the encoder).
# ---------------------------------------------------------------------------
def _fused_interact_classify_kernel(u_ref, v_ref, w1_ref, w2_ref,
                                    wc_ref, bc_ref,
                                    logits_u_ref, logits_v_ref):
    u = u_ref[0]                       # (Su, H) bf16
    v = v_ref[0]                       # (Sv, H) bf16
    w1 = w1_ref[...]                   # (H, H)  bf16
    w2 = w2_ref[...]                   # (H, H)  bf16
    wc = wc_ref[...]                   # (4H, LANE) bf16  (real cols 0:2, rest 0)
    bc = bc_ref[...]                   # (1, LANE)  f32
    H = u.shape[-1]

    # ---- attention_hidden_v: P = softmax((tanh(u@W1) @ v^T)^T) ; att_v = P @ u
    # The transposed score matrix (Sv, Su) is produced directly by contracting
    # the last dims of both operands (MXU-native, no XLU transpose).
    t1 = jnp.tanh(jnp.dot(u, w1, preferred_element_type=jnp.float32)
                  ).astype(jnp.bfloat16)                            # (Su, H)
    sp = lax.dot_general(v, t1, (((1,), (1,)), ((), ())),
                         preferred_element_type=jnp.float32)        # (Sv, Su)
    sp = sp - jnp.max(sp, axis=-1, keepdims=True)
    e = jnp.exp(sp)
    p = e * pl.reciprocal(jnp.sum(e, axis=-1, keepdims=True), approx=True)
    att_v = jnp.dot(p.astype(jnp.bfloat16), u,
                    preferred_element_type=jnp.float32)             # (Sv, H) f32

    # ---- attention_hidden_u: Q = softmax((tanh(v@W2) @ u^T)^T) ; att_u = Q @ v
    t2 = jnp.tanh(jnp.dot(v, w2, preferred_element_type=jnp.float32)
                  ).astype(jnp.bfloat16)                            # (Sv, H)
    sh = lax.dot_general(u, t2, (((1,), (1,)), ((), ())),
                         preferred_element_type=jnp.float32)        # (Su, Sv)
    sh = sh - jnp.max(sh, axis=-1, keepdims=True)
    e2 = jnp.exp(sh)
    q = e2 * pl.reciprocal(jnp.sum(e2, axis=-1, keepdims=True), approx=True)
    att_u = jnp.dot(q.astype(jnp.bfloat16), v,
                    preferred_element_type=jnp.float32)             # (Su, H) f32

    # ---- fused [x, a, x-a, x*a] concat + classifier.
    # W_cls is padded to LANE output columns outside the kernel, so the MXU
    # result and the output store are lane-dense (no masked vst.msk).
    def classifier(x_bf16, a_f32):
        x_f32 = x_bf16.astype(jnp.float32)
        a_bf16 = a_f32.astype(jnp.bfloat16)
        acc = bc + jnp.dot(x_bf16, wc[0 * H:1 * H],
                           preferred_element_type=jnp.float32)
        acc = acc + jnp.dot(a_bf16, wc[1 * H:2 * H],
                            preferred_element_type=jnp.float32)
        acc = acc + jnp.dot((x_f32 - a_f32).astype(jnp.bfloat16),
                            wc[2 * H:3 * H],
                            preferred_element_type=jnp.float32)
        acc = acc + jnp.dot((x_f32 * a_f32).astype(jnp.bfloat16),
                            wc[3 * H:4 * H],
                            preferred_element_type=jnp.float32)
        return acc                                                  # (S, LANE)

    logits_u_ref[0] = classifier(u, att_u)
    logits_v_ref[0] = classifier(v, att_v)


def interact_and_classify(u, v, w1, w2, w_cls, b_cls):
    """u, v: (B, S, H) activations. w_cls: (4H, 2) = Linear.weight.T, b_cls: (1, 2).
    Returns (logits_u, logits_v), each (B, S, 2) f32."""
    B, S, H = u.shape

    # Lane-dense classifier: pad the 2-wide output dimension to LANE columns
    # (once, at trace time).  The kernel then stores full 128-lane rows.
    wc = jnp.zeros((4 * H, LANE), jnp.bfloat16).at[:, :2].set(
        w_cls.astype(jnp.bfloat16))
    bc = jnp.zeros((1, LANE), jnp.float32).at[:, :2].set(
        b_cls.astype(jnp.float32))

    logits_u_p, logits_v_p = pl.pallas_call(
        _fused_interact_classify_kernel,
        out_shape=(jax.ShapeDtypeStruct((B, S, LANE), jnp.float32),
                   jax.ShapeDtypeStruct((B, S, LANE), jnp.float32)),
        grid_spec=pltpu.PrefetchScalarGridSpec(
            num_scalar_prefetch=0,
            grid=(B,),
            in_specs=[pl.BlockSpec((1, S, H), lambda b: (b, 0, 0)),
                      pl.BlockSpec((1, S, H), lambda b: (b, 0, 0)),
                      pl.BlockSpec((H, H), lambda b: (0, 0)),
                      pl.BlockSpec((H, H), lambda b: (0, 0)),
                      pl.BlockSpec((4 * H, LANE), lambda b: (0, 0)),
                      pl.BlockSpec((1, LANE), lambda b: (0, 0))],
            out_specs=[pl.BlockSpec((1, S, LANE), lambda b: (b, 0, 0)),
                       pl.BlockSpec((1, S, LANE), lambda b: (b, 0, 0))]),
        compiler_params=pltpu.CompilerParams(
            dimension_semantics=("parallel",),      # keeps v7x megacore busy
            vmem_limit_bytes=32 * 1024 * 1024),
    )(u.astype(jnp.bfloat16), v.astype(jnp.bfloat16),
      w1.astype(jnp.bfloat16), w2.astype(jnp.bfloat16), wc, bc)

    # Slice the lane-padded logits back to the real 2-way output.
    return logits_u_p[..., :2], logits_v_p[..., :2]


# ---------------------------------------------------------------------------
# Plain-JAX glue: single-layer bidirectional LSTM (PyTorch gate order i,f,g,o).
# ---------------------------------------------------------------------------
def _lstm_one_dir(x, w_ih, w_hh, b_ih, b_hh, h0, c0, reverse):
    # x: (B, S, D); w_ih: (4L, D); w_hh: (4L, L)
    xg = jnp.einsum('bsd,gd->bsg', x, w_ih) + b_ih          # (B, S, 4L)
    xg = jnp.swapaxes(xg, 0, 1)                              # (S, B, 4L)
    if reverse:
        xg = xg[::-1]

    def step(carry, xt):
        h, c = carry
        g = xt + h @ w_hh.T + b_hh
        i, f, gg, o = jnp.split(g, 4, axis=-1)
        i = jax.nn.sigmoid(i)
        f = jax.nn.sigmoid(f)
        gg = jnp.tanh(gg)
        o = jax.nn.sigmoid(o)
        c = f * c + i * gg
        h = o * jnp.tanh(c)
        return (h, c), h

    (hT, cT), out = lax.scan(step, (h0, c0), xg)
    out = jnp.swapaxes(out, 0, 1)                            # (B, S, L)
    if reverse:
        out = out[:, ::-1]
    return out, (hT, cT)


def bilstm(x, params, h0=None, c0=None):
    B = x.shape[0]
    L = params['w_hh_f'].shape[1]
    if h0 is None:
        h0 = jnp.zeros((2, B, L), jnp.float32)
        c0 = jnp.zeros((2, B, L), jnp.float32)
    out_f, (hf, cf) = _lstm_one_dir(x, params['w_ih_f'], params['w_hh_f'],
                                    params['b_ih_f'], params['b_hh_f'],
                                    h0[0], c0[0], reverse=False)
    out_b, (hb, cb) = _lstm_one_dir(x, params['w_ih_b'], params['w_hh_b'],
                                    params['b_ih_b'], params['b_hh_b'],
                                    h0[1], c0[1], reverse=True)
    out = jnp.concatenate([out_f, out_b], axis=-1)           # (B, S, 2L)
    hn = jnp.stack([hf, hb])                                  # (2, B, L)
    cn = jnp.stack([cf, cb])
    return out, (hn, cn)


# ---------------------------------------------------------------------------
# Full forward (mirrors Rationale_extra.forward)
# ---------------------------------------------------------------------------
def rationale_forward(params, u_ids, u_mask, v_ids, v_mask):
    # TODO(synk): pretrained BERT/RoBERTa encoder replaced by a deterministic
    # embedding lookup producing the same (B, S, D_ENC) hidden-state tensor.
    u_states = params['embed'][u_ids] * u_mask[..., None]
    v_states = params['embed'][v_ids] * v_mask[..., None]

    out_ph_v, (hn_ph_v, cn_ph_v) = bilstm(v_states, params['phread'])
    out_enc_u, _ = bilstm(u_states, params['lstmenc'], hn_ph_v, cn_ph_v)
    out_ph_u, (hn_ph_u, cn_ph_u) = bilstm(u_states, params['phread'])
    out_enc_v, _ = bilstm(v_states, params['lstmenc'], hn_ph_u, cn_ph_u)

    # Single fused Pallas kernel: interaction attention + both classifier heads.
    logits_u, logits_v = interact_and_classify(
        out_enc_u, out_enc_v, params['w1'], params['w2'],
        params['w_cls'], params['b_cls'])
    return logits_u, logits_v


# ---------------------------------------------------------------------------
# Deterministic parameter construction
# ---------------------------------------------------------------------------
def init_params(key, vocab, d_enc, lstm):
    H = 2 * lstm
    ks = jax.random.split(key, 8)

    def nrm(k, shape, scale=0.1):
        return jax.random.normal(k, shape, jnp.float32) * scale

    def lstm_params(k):
        kk = jax.random.split(k, 8)
        return dict(
            w_ih_f=nrm(kk[0], (4 * lstm, d_enc)), w_hh_f=nrm(kk[1], (4 * lstm, lstm)),
            b_ih_f=nrm(kk[2], (4 * lstm,)),       b_hh_f=nrm(kk[3], (4 * lstm,)),
            w_ih_b=nrm(kk[4], (4 * lstm, d_enc)), w_hh_b=nrm(kk[5], (4 * lstm, lstm)),
            b_ih_b=nrm(kk[6], (4 * lstm,)),       b_hh_b=nrm(kk[7], (4 * lstm,)),
        )

    return dict(
        embed=nrm(ks[0], (vocab, d_enc), 0.5),
        phread=lstm_params(ks[1]),
        lstmenc=lstm_params(ks[2]),
        w1=nrm(ks[3], (H, H)),
        w2=nrm(ks[4], (H, H)),
        w_cls=nrm(ks[5], (4 * H, 2)),   # stored as Linear.weight.T
        b_cls=nrm(ks[6], (1, 2)),
    )


if __name__ == "__main__":
    B, S = 2, 8
    D_ENC = 64        # stand-in for 768
    LSTM = 64         # stand-in for 450
    VOCAB = 100

    key = jax.random.PRNGKey(0)
    k_p, k_u, k_v = jax.random.split(key, 3)
    params = init_params(k_p, VOCAB, D_ENC, LSTM)

    u_ids = jax.random.randint(k_u, (B, S), 0, VOCAB)
    v_ids = jax.random.randint(k_v, (B, S), 0, VOCAB)
    u_mask = jnp.ones((B, S), jnp.float32)
    v_mask = jnp.ones((B, S), jnp.float32)

    fwd = jax.jit(rationale_forward)
    logits_u, logits_v = fwd(params, u_ids, u_mask, v_ids, v_mask)
    jax.block_until_ready((logits_u, logits_v))

    assert logits_u.shape == (B, S, 2) and logits_v.shape == (B, S, 2)
    assert bool(jnp.all(jnp.isfinite(logits_u))) and bool(jnp.all(jnp.isfinite(logits_v)))
    print("KERNEL_OK")
</pallas_src>

<mosaic_0001>
module attributes {stable_mosaic.version = 11 : i64} {
  func.func @_fused_interact_classify_kernel(%arg0: i32, %arg1: memref<1x8x128xbf16, #tpu.memory_space<vmem>>, %arg2: memref<1x8x128xbf16, #tpu.memory_space<vmem>>, %arg3: memref<128x128xbf16, #tpu.memory_space<vmem>>, %arg4: memref<128x128xbf16, #tpu.memory_space<vmem>>, %arg5: memref<512x128xbf16, #tpu.memory_space<vmem>>, %arg6: memref<1x128xf32, #tpu.memory_space<vmem>>, %arg7: memref<1x8x128xf32, #tpu.memory_space<vmem>>, %arg8: memref<1x8x128xf32, #tpu.memory_space<vmem>>) attributes {dimension_semantics = [#tpu.dimension_semantics<parallel>], iteration_bounds = array<i64: 2>, scalar_prefetch = 0 : i64, scratch_operands = 0 : i64, tpu.core_type = #tpu.core_type<tc>, window_params = [{transform_indices = @transform_0, window_bounds = array<i64: 1, 8, 128>}, {transform_indices = @transform_1, window_bounds = array<i64: 1, 8, 128>}, {pipeline_mode = #tpu.pipeline_mode<synchronous>, transform_indices = @transform_2, window_bounds = array<i64: 128, 128>}, {pipeline_mode = #tpu.pipeline_mode<synchronous>, transform_indices = @transform_3, window_bounds = array<i64: 128, 128>}, {pipeline_mode = #tpu.pipeline_mode<synchronous>, transform_indices = @transform_4, window_bounds = array<i64: 512, 128>}, {pipeline_mode = #tpu.pipeline_mode<synchronous>, transform_indices = @transform_5, window_bounds = array<i64: 1, 128>}, {transform_indices = @transform_6, window_bounds = array<i64: 1, 8, 128>}, {transform_indices = @transform_7, window_bounds = array<i64: 1, 8, 128>}]} {
    %c0 = arith.constant 0 : index
    %c0_0 = arith.constant 0 : index
    %c0_1 = arith.constant 0 : index
    %0 = vector.load %arg1[%c0, %c0_0, %c0_1] : memref<1x8x128xbf16, #tpu.memory_space<vmem>>, vector<1x8x128xbf16>
    %1 = vector.shape_cast %0 : vector<1x8x128xbf16> to vector<8x128xbf16>
    %c0_2 = arith.constant 0 : index
    %c0_3 = arith.constant 0 : index
    %c0_4 = arith.constant 0 : index
    %2 = vector.load %arg2[%c0_2, %c0_3, %c0_4] : memref<1x8x128xbf16, #tpu.memory_space<vmem>>, vector<1x8x128xbf16>
    %3 = vector.shape_cast %2 : vector<1x8x128xbf16> to vector<8x128xbf16>
    %c0_5 = arith.constant 0 : index
    %c0_6 = arith.constant 0 : index
    %4 = vector.load %arg3[%c0_5, %c0_6] : memref<128x128xbf16, #tpu.memory_space<vmem>>, vector<128x128xbf16>
    %c0_7 = arith.constant 0 : index
    %c0_8 = arith.constant 0 : index
    %5 = vector.load %arg4[%c0_7, %c0_8] : memref<128x128xbf16, #tpu.memory_space<vmem>>, vector<128x128xbf16>
    %c0_9 = arith.constant 0 : index
    %c0_10 = arith.constant 0 : index
    %6 = vector.load %arg5[%c0_9, %c0_10] : memref<512x128xbf16, #tpu.memory_space<vmem>>, vector<512x128xbf16>
    %c0_11 = arith.constant 0 : index
    %c0_12 = arith.constant 0 : index
    %7 = vector.load %arg6[%c0_11, %c0_12] : memref<1x128xf32, #tpu.memory_space<vmem>>, vector<1x128xf32>
    %cst = arith.constant dense<0.000000e+00> : vector<8x128xf32>
    %8 = tpu.matmul %1, %4, %cst {dimension_numbers = #tpu.dot_dimension_numbers<[1], [0], [0], [1], [0, 0, 1, 1], [], []>} : vector<8x128xbf16>, vector<128x128xbf16>, vector<8x128xf32> -> vector<8x128xf32>
    %9 = math.tanh %8 : vector<8x128xf32>
    %10 = arith.truncf %9 : vector<8x128xf32> to vector<8x128xbf16>
    %cst_13 = arith.constant dense<0.000000e+00> : vector<8x8xf32>
    %11 = tpu.matmul %3, %10, %cst_13 {dimension_numbers = #tpu.dot_dimension_numbers<[1], [1], [0], [0], [0, 0, 1, 0], [], []>} : vector<8x128xbf16>, vector<8x128xbf16>, vector<8x8xf32> -> vector<8x8xf32>
    %cst_14 = arith.constant dense<0xFF800000> : vector<8xf32>
    %12 = vector.multi_reduction <maximumf>, %11, %cst_14 [1] : vector<8x8xf32> to vector<8xf32>
    %13 = vector.shape_cast %12 : vector<8xf32> to vector<8x1xf32>
    %14 = vector.broadcast %13 : vector<8x1xf32> to vector<8x8xf32>
    %15 = arith.subf %11, %14 : vector<8x8xf32>
    %16 = math.exp %15 : vector<8x8xf32>
    %cst_15 = arith.constant dense<0.000000e+00> : vector<8xf32>
    %17 = vector.multi_reduction <add>, %16, %cst_15 [1] : vector<8x8xf32> to vector<8xf32>
    %18 = vector.shape_cast %17 : vector<8xf32> to vector<8x1xf32>
    %19 = tpu.reciprocal %18 {approx = true} : vector<8x1xf32> -> vector<8x1xf32>
    %20 = vector.broadcast %19 : vector<8x1xf32> to vector<8x8xf32>
    %21 = arith.mulf %16, %20 : vector<8x8xf32>
    %22 = arith.truncf %21 : vector<8x8xf32> to vector<8x8xbf16>
    %cst_16 = arith.constant dense<0.000000e+00> : vector<8x128xf32>
    %23 = tpu.matmul %22, %1, %cst_16 {dimension_numbers = #tpu.dot_dimension_numbers<[1], [0], [0], [1], [0, 0, 1, 1], [], []>} : vector<8x8xbf16>, vector<8x128xbf16>, vector<8x128xf32> -> vector<8x128xf32>
    %cst_17 = arith.constant dense<0.000000e+00> : vector<8x128xf32>
    %24 = tpu.matmul %3, %5, %cst_17 {dimension_numbers = #tpu.dot_dimension_numbers<[1], [0], [0], [1], [0, 0, 1, 1], [], []>} : vector<8x128xbf16>, vector<128x128xbf16>, vector<8x128xf32> -> vector<8x128xf32>
    %25 = math.tanh %24 : vector<8x128xf32>
    %26 = arith.truncf %25 : vector<8x128xf32> to vector<8x128xbf16>
    %cst_18 = arith.constant dense<0.000000e+00> : vector<8x8xf32>
    %27 = tpu.matmul %1, %26, %cst_18 {dimension_numbers = #tpu.dot_dimension_numbers<[1], [1], [0], [0], [0, 0, 1, 0], [], []>} : vector<8x128xbf16>, vector<8x128xbf16>, vector<8x8xf32> -> vector<8x8xf32>
    %cst_19 = arith.constant dense<0xFF800000> : vector<8xf32>
    %28 = vector.multi_reduction <maximumf>, %27, %cst_19 [1] : vector<8x8xf32> to vector<8xf32>
    %29 = vector.shape_cast %28 : vector<8xf32> to vector<8x1xf32>
    %30 = vector.broadcast %29 : vector<8x1xf32> to vector<8x8xf32>
    %31 = arith.subf %27, %30 : vector<8x8xf32>
    %32 = math.exp %31 : vector<8x8xf32>
    %cst_20 = arith.constant dense<0.000000e+00> : vector<8xf32>
    %33 = vector.multi_reduction <add>, %32, %cst_20 [1] : vector<8x8xf32> to vector<8xf32>
    %34 = vector.shape_cast %33 : vector<8xf32> to vector<8x1xf32>
    %35 = tpu.reciprocal %34 {approx = true} : vector<8x1xf32> -> vector<8x1xf32>
    %36 = vector.broadcast %35 : vector<8x1xf32> to vector<8x8xf32>
    %37 = arith.mulf %32, %36 : vector<8x8xf32>
    %38 = arith.truncf %37 : vector<8x8xf32> to vector<8x8xbf16>
    %cst_21 = arith.constant dense<0.000000e+00> : vector<8x128xf32>
    %39 = tpu.matmul %38, %3, %cst_21 {dimension_numbers = #tpu.dot_dimension_numbers<[1], [0], [0], [1], [0, 0, 1, 1], [], []>} : vector<8x8xbf16>, vector<8x128xbf16>, vector<8x128xf32> -> vector<8x128xf32>
    %40 = arith.extf %1 : vector<8x128xbf16> to vector<8x128xf32>
    %41 = arith.truncf %39 : vector<8x128xf32> to vector<8x128xbf16>
    %42 = vector.extract_strided_slice %6 {offsets = [0, 0], sizes = [128, 128], strides = [1, 1]} : vector<512x128xbf16> to vector<128x128xbf16>
    %cst_22 = arith.constant dense<0.000000e+00> : vector<8x128xf32>
    %43 = tpu.matmul %1, %42, %cst_22 {dimension_numbers = #tpu.dot_dimension_numbers<[1], [0], [0], [1], [0, 0, 1, 1], [], []>} : vector<8x128xbf16>, vector<128x128xbf16>, vector<8x128xf32> -> vector<8x128xf32>
    %44 = vector.broadcast %7 : vector<1x128xf32> to vector<8x128xf32>
    %45 = arith.addf %44, %43 : vector<8x128xf32>
    %46 = vector.extract_strided_slice %6 {offsets = [128, 0], sizes = [128, 128], strides = [1, 1]} : vector<512x128xbf16> to vector<128x128xbf16>
    %cst_23 = arith.constant dense<0.000000e+00> : vector<8x128xf32>
    %47 = tpu.matmul %41, %46, %cst_23 {dimension_numbers = #tpu.dot_dimension_numbers<[1], [0], [0], [1], [0, 0, 1, 1], [], []>} : vector<8x128xbf16>, vector<128x128xbf16>, vector<8x128xf32> -> vector<8x128xf32>
    %48 = arith.addf %45, %47 : vector<8x128xf32>
    %49 = arith.subf %40, %39 : vector<8x128xf32>
    %50 = arith.truncf %49 : vector<8x128xf32> to vector<8x128xbf16>
    %51 = vector.extract_strided_slice %6 {offsets = [256, 0], sizes = [128, 128], strides = [1, 1]} : vector<512x128xbf16> to vector<128x128xbf16>
    %cst_24 = arith.constant dense<0.000000e+00> : vector<8x128xf32>
    %52 = tpu.matmul %50, %51, %cst_24 {dimension_numbers = #tpu.dot_dimension_numbers<[1], [0], [0], [1], [0, 0, 1, 1], [], []>} : vector<8x128xbf16>, vector<128x128xbf16>, vector<8x128xf32> -> vector<8x128xf32>
    %53 = arith.addf %48, %52 : vector<8x128xf32>
    %54 = arith.mulf %40, %39 : vector<8x128xf32>
    %55 = arith.truncf %54 : vector<8x128xf32> to vector<8x128xbf16>
    %56 = vector.extract_strided_slice %6 {offsets = [384, 0], sizes = [128, 128], strides = [1, 1]} : vector<512x128xbf16> to vector<128x128xbf16>
    %cst_25 = arith.constant dense<0.000000e+00> : vector<8x128xf32>
    %57 = tpu.matmul %55, %56, %cst_25 {dimension_numbers = #tpu.dot_dimension_numbers<[1], [0], [0], [1], [0, 0, 1, 1], [], []>} : vector<8x128xbf16>, vector<128x128xbf16>, vector<8x128xf32> -> vector<8x128xf32>
    %58 = arith.addf %53, %57 : vector<8x128xf32>
    %c0_26 = arith.constant 0 : index
    %c0_27 = arith.constant 0 : index
    %c0_28 = arith.constant 0 : index
    %59 = vector.load %arg7[%c0_26, %c0_27, %c0_28] : memref<1x8x128xf32, #tpu.memory_space<vmem>>, vector<1x8x128xf32>
    %60 = vector.shape_cast %59 : vector<1x8x128xf32> to vector<8x128xf32>
    %61 = vector.shape_cast %58 : vector<8x128xf32> to vector<1x8x128xf32>
    tpu.vector_store %arg7[%c0_26, %c0_27, %c0_28], %61 {strides = array<i32>} : memref<1x8x128xf32, #tpu.memory_space<vmem>>, vector<1x8x128xf32>,
    %62 = arith.extf %3 : vector<8x128xbf16> to vector<8x128xf32>
    %63 = arith.truncf %23 : vector<8x128xf32> to vector<8x128xbf16>
    %64 = vector.extract_strided_slice %6 {offsets = [0, 0], sizes = [128, 128], strides = [1, 1]} : vector<512x128xbf16> to vector<128x128xbf16>
    %cst_29 = arith.constant dense<0.000000e+00> : vector<8x128xf32>
    %65 = tpu.matmul %3, %64, %cst_29 {dimension_numbers = #tpu.dot_dimension_numbers<[1], [0], [0], [1], [0, 0, 1, 1], [], []>} : vector<8x128xbf16>, vector<128x128xbf16>, vector<8x128xf32> -> vector<8x128xf32>
    %66 = vector.broadcast %7 : vector<1x128xf32> to vector<8x128xf32>
    %67 = arith.addf %66, %65 : vector<8x128xf32>
    %68 = vector.extract_strided_slice %6 {offsets = [128, 0], sizes = [128, 128], strides = [1, 1]} : vector<512x128xbf16> to vector<128x128xbf16>
    %cst_30 = arith.constant dense<0.000000e+00> : vector<8x128xf32>
    %69 = tpu.matmul %63, %68, %cst_30 {dimension_numbers = #tpu.dot_dimension_numbers<[1], [0], [0], [1], [0, 0, 1, 1], [], []>} : vector<8x128xbf16>, vector<128x128xbf16>, vector<8x128xf32> -> vector<8x128xf32>
    %70 = arith.addf %67, %69 : vector<8x128xf32>
    %71 = arith.subf %62, %23 : vector<8x128xf32>
    %72 = arith.truncf %71 : vector<8x128xf32> to vector<8x128xbf16>
    %73 = vector.extract_strided_slice %6 {offsets = [256, 0], sizes = [128, 128], strides = [1, 1]} : vector<512x128xbf16> to vector<128x128xbf16>
    %cst_31 = arith.constant dense<0.000000e+00> : vector<8x128xf32>
    %74 = tpu.matmul %72, %73, %cst_31 {dimension_numbers = #tpu.dot_dimension_numbers<[1], [0], [0], [1], [0, 0, 1, 1], [], []>} : vector<8x128xbf16>, vector<128x128xbf16>, vector<8x128xf32> -> vector<8x128xf32>
    %75 = arith.addf %70, %74 : vector<8x128xf32>
    %76 = arith.mulf %62, %23 : vector<8x128xf32>
    %77 = arith.truncf %76 : vector<8x128xf32> to vector<8x128xbf16>
    %78 = vector.extract_strided_slice %6 {offsets = [384, 0], sizes = [128, 128], strides = [1, 1]} : vector<512x128xbf16> to vector<128x128xbf16>
    %cst_32 = arith.constant dense<0.000000e+00> : vector<8x128xf32>
    %79 = tpu.matmul %77, %78, %cst_32 {dimension_numbers = #tpu.dot_dimension_numbers<[1], [0], [0], [1], [0, 0, 1, 1], [], []>} : vector<8x128xbf16>, vector<128x128xbf16>, vector<8x128xf32> -> vector<8x128xf32>
    %80 = arith.addf %75, %79 : vector<8x128xf32>
    %c0_33 = arith.constant 0 : index
    %c0_34 = arith.constant 0 : index
    %c0_35 = arith.constant 0 : index
    %81 = vector.load %arg8[%c0_33, %c0_34, %c0_35] : memref<1x8x128xf32, #tpu.memory_space<vmem>>, vector<1x8x128xf32>
    %82 = vector.shape_cast %81 : vector<1x8x128xf32> to vector<8x128xf32>
    %83 = vector.shape_cast %80 : vector<8x128xf32> to vector<1x8x128xf32>
    tpu.vector_store %arg8[%c0_33, %c0_34, %c0_35], %83 {strides = array<i32>} : memref<1x8x128xf32, #tpu.memory_space<vmem>>, vector<1x8x128xf32>,
    return
  }
  func.func @transform_0(%arg0: i32) -> (i32, i32, i32) {
    %c0_i32 = arith.constant 0 : i32
    %c0_i32_0 = arith.constant 0 : i32
    %c0_i32_1 = arith.constant 0 : i32
    return %arg0, %c0_i32, %c0_i32_0 : i32, i32, i32
  }
  func.func @transform_1(%arg0: i32) -> (i32, i32, i32) {
    %c0_i32 = arith.constant 0 : i32
    %c0_i32_0 = arith.constant 0 : i32
    %c0_i32_1 = arith.constant 0 : i32
    return %arg0, %c0_i32, %c0_i32_0 : i32, i32, i32
  }
  func.func @transform_2(%arg0: i32) -> (i32, i32) {
    %c0_i32 = arith.constant 0 : i32
    %c0_i32_0 = arith.constant 0 : i32
    %c0_i32_1 = arith.constant 0 : i32
    return %c0_i32, %c0_i32_0 : i32, i32
  }
  func.func @transform_3(%arg0: i32) -> (i32, i32) {
    %c0_i32 = arith.constant 0 : i32
    %c0_i32_0 = arith.constant 0 : i32
    %c0_i32_1 = arith.constant 0 : i32
    return %c0_i32, %c0_i32_0 : i32, i32
  }
  func.func @transform_4(%arg0: i32) -> (i32, i32) {
    %c0_i32 = arith.constant 0 : i32
    %c0_i32_0 = arith.constant 0 : i32
    %c0_i32_1 = arith.constant 0 : i32
    return %c0_i32, %c0_i32_0 : i32, i32
  }
  func.func @transform_5(%arg0: i32) -> (i32, i32) {
    %c0_i32 = arith.constant 0 : i32
    %c0_i32_0 = arith.constant 0 : i32
    %c0_i32_1 = arith.constant 0 : i32
    return %c0_i32, %c0_i32_0 : i32, i32
  }
  func.func @transform_6(%arg0: i32) -> (i32, i32, i32) {
    %c0_i32 = arith.constant 0 : i32
    %c0_i32_0 = arith.constant 0 : i32
    %c0_i32_1 = arith.constant 0 : i32
    return %arg0, %c0_i32, %c0_i32_0 : i32, i32, i32
  }
  func.func @transform_7(%arg0: i32) -> (i32, i32, i32) {
    %c0_i32 = arith.constant 0 : i32
    %c0_i32_0 = arith.constant 0 : i32
    %c0_i32_1 = arith.constant 0 : i32
    return %arg0, %c0_i32, %c0_i32_0 : i32, i32, i32
  }
}

</mosaic_0001>

<bundles_post_ra>
// kernel: custom-call.6
= control target key start
LH: loop header
LB: loop body
LE: loop exit
PB: predicated region body
PF: predicated region fallthrough
CT: control target
= control target key end

     0   :  { %s6_s0 = inlined_call_operand.vmem [shape: f32[2,64], index: 0, kind: output, shape index: {}]  }

// kernel: rationale_forward.1
= control target key start
LH: loop header
LB: loop body
LE: loop exit
PB: predicated region body
PF: predicated region fallthrough
CT: control target
= control target key end

     0   :  { %s1920_s24 = smov 0   ;;  %s2369_s0 = inlined_call_operand.vmem [shape: bf16[2,8,128], index: 0, kind: input, shape index: {}]   ;;  %s2370_s1 = inlined_call_operand.vmem [shape: bf16[2,8,128], index: 1, kind: input, shape index: {}]   ;;  %s2371_s2 = inlined_call_operand.vmem [shape: bf16[128,128], index: 2, kind: input, shape index: {}]   ;;  %s2372_s3 = inlined_call_operand.vmem [shape: bf16[128,128], index: 3, kind: input, shape index: {}]   ;;  %s2373_s4 = inlined_call_operand.vmem [shape: bf16[512,128], index: 4, kind: input, shape index: {}]   ;;  %s2374_s5 = inlined_call_operand.vmem [shape: f32[1,128], index: 5, kind: input, shape index: {}]   ;;  %s2375_s6 = inlined_call_operand.vmem [shape: f32[2,8,128], index: 6, kind: output, shape index: {0}]   ;;  %s2376_s7 = inlined_call_operand.vmem [shape: f32[2,8,128], index: 7, kind: output, shape index: {1}]  }
   0x1 LB: > { %s1416_s25 = sadd.s32 4294967295, %s1876_s24   ;;  %p1420_p0 = scmp.ge.s32.totalorder %s1876_s24, 1  ;;  %s1876_s24 = sphi %s1920_s24, %s18_s24  }
   0x2   : > { %p248_p1 = scmp.lt.s32.totalorder %s1876_s24, 3 }
   0x4   : > { %p249_p2 = pnand %p1420_p0, %p248_p1 }
   0x5   : > { %p286_p3 = scmp.lt.s32.totalorder (!%p249_p2), %s1416_s25, 1 }
   0x6   : > { %252 = sbr.rel (%p249_p2) target bundleno = 2012 (0x7dc), region = 44 }
   0xb   : > { %v1810_v0 = vld [vmem:[%s2371_s2 + $0x38] sm:$0xff]   ;;  %v1878_v1 = vmov 0.0   ;;  %v1811_v2 = vld [vmem:[%s2371_s2 + $0x30] sm:$0xff]   ;;  %vm1879_vm0 = vmmov 0   ;;  %s2378_s25 = smov (!%p286_p3, %s1416_s25), 1  ;;  %v1812_v3 = vld [vmem:[%s2371_s2 + $0x28] sm:$0xff]  }
   0xc   : > { %1576 = vmatprep.subr.bf16.mxu0 %v1878_v1  ;;  %1596 = vmatprep.subr.bf16.mxu1 %v1878_v1  ;;  %v1813_v4 = vld [vmem:[%s2371_s2 + $0x20] sm:$0xff]   ;;  %s1421_s11 = sshll.u32 %s2378_s25, 2  ;;  %v1814_v5 = vld [vmem:[%s2371_s2 + $0x18] sm:$0xff]   ;;  %v1815_v6 = vld [vmem:[%s2371_s2 + $0x10] sm:$0xff]   ;;  %vm532_vm1 = vcmask 64512   ;;  %vm548_vm2 = vcmask 1043456  }
   0xd   : > { %1577 = vmatpush3.bf16.msra.mxu0 %v1810_v0  ;;  %1592 = vmatprep.mubr.msk.bf16.mxu0 %vm1879_vm0, %v1878_v1  ;;  %v1816_v7 = vld [vmem:[%s2371_s2 + $0x8] sm:$0xff]   ;;  %v1817_v8 = vld [vmem:[%s2371_s2] sm:$0xff]   ;;  %s289_s22 = scalar_lea.vmem %s2369_s0, %s1421_s11  ;;  %s293_s27 = scalar_lea.vmem %s2370_s1, %s1421_s11  ;;  %v1818_v31 = vld [vmem:[%s2372_s3 + $0x38] sm:$0xff]  }
   0xe   : > { %1578 = vmatprep.subr.bf16.mxu0 %v1878_v1  ;;  %1598 = vmatprep.mubr.msk.bf16.mxu1 %vm1879_vm0, %v1878_v1  ;;  %v1973_v9 = vld [vmem:[%s289_s22] sm:$0xf]  ;;  %v1819_v33 = vld [vmem:[%s2372_s3 + $0x30] sm:$0xff]   ;;  %v1820_v34 = vld [vmem:[%s2372_s3 + $0x28] sm:$0xff]   ;;  %s1423_s26 = sshll.u32 %s2378_s25, 3 }
   0xf   : > { %v1985_v16 = vld [vmem:[%s293_s27] sm:$0xf]  ;;  %v550_v27 = vsel %vm548_vm2, %v1973_v9, 0  ;;  %v1822_v36 = vld [vmem:[%s2372_s3 + $0x18] sm:$0xff]   ;;  %v1823_v37 = vld [vmem:[%s2372_s3 + $0x10] sm:$0xff]   ;;  %s297_s29 = scalar_lea.vmem %s2375_s6, %s1423_s26  ;;  %s301_s8 = scalar_lea.vmem %s2376_s7, %s1423_s26 }
  0x10   : > { %v1821_v35 = vld [vmem:[%s2372_s3 + $0x20] sm:$0xff]   ;;  %v1824_v38 = vld [vmem:[%s2372_s3 + $0x8] sm:$0xff]   ;;  %v738_v60 = vsel %vm548_vm2, %v1985_v16, 0  ;;  %v2047_v61 = vld [vmem:[%s2373_s4 + $0x78] sm:$0xff]  }
  0x11   : > { %1579 = vmatpush3.bf16.msra.mxu0 %v1811_v2  ;;  %v1825_v39 = vld [vmem:[%s2372_s3] sm:$0xff]   ;;  %v2054_v62 = vld [vmem:[%s2373_s4 + $0x70] sm:$0xff]   ;;  %v2061_v63 = vld [vmem:[%s2373_s4 + $0x68] sm:$0xff]  }
  0x12   : > { %1580 = vmatprep.subr.bf16.mxu0 %v1878_v1  ;;  %v2068_v0 = vld [vmem:[%s2373_s4 + $0x60] sm:$0xff]   ;;  %v2075_v2 = vld [vmem:[%s2373_s4 + $0x58] sm:$0xff]  }
  0x15   : > { %1581 = vmatpush3.bf16.msra.mxu0 %v1812_v3  ;;  %v2082_v3 = vld [vmem:[%s2373_s4 + $0x50] sm:$0xff]  }
  0x16   : > { %1582 = vmatprep.subr.bf16.mxu0 %v1878_v1 }
  0x19   : > { %1583 = vmatpush3.bf16.msra.mxu0 %v1813_v4  ;;  %v2089_v4 = vld [vmem:[%s2373_s4 + $0x48] sm:$0xff]  }
  0x1a   : > { %1584 = vmatprep.subr.bf16.mxu0 %v1878_v1 }
  0x1d   : > { %1585 = vmatpush3.bf16.msra.mxu0 %v1814_v5  ;;  %v2096_v5 = vld [vmem:[%s2373_s4 + $0x40] sm:$0xff]  }
  0x1e   : > { %1586 = vmatprep.subr.bf16.mxu0 %v1878_v1 }
  0x21   : > { %1587 = vmatpush3.bf16.msra.mxu0 %v1815_v6 }
  0x22   : > { %1588 = vmatprep.subr.bf16.mxu0 %v1878_v1 }
  0x25   : > { %1589 = vmatpush3.bf16.msra.mxu0 %v1816_v7 }
  0x26   : > { %1590 = vmatprep.subr.bf16.mxu0 %v1878_v1 }
  0x29   : > { %1591 = vmatpush3.bf16.msra.mxu0 %v1817_v8 }
  0x2a   : > { %1628 = vmatprep.subr.bf16.mxu0 %v1878_v1 }
  0x2c   : > { %1593 = vmatmul.mubr.bf16.vlgmr.msra.gmra.mxu0 %v1973_v9 }
  0x2d   : > { %1630 = vmatprep.mubr.msk.bf16.mxu0 %vm1879_vm0, %v1878_v1 }
  0xec   : > { %v484_v10 = vpop.f32.mrf.mxu0 }
  0xed   : > { %1858 = vtanh.f32 %v484_v10  ;;  %v2103_v10 = vld [vmem:[%s2373_s4 + $0x38] sm:$0xff]  }
  0xee   : > { %v1594_v11 = vpop.f32.mrf.mxu0 }
  0xf0   : > { %v487_v12 = vpop.f32.mrf.mxu0 }
  0xf1   : > { %v2110_v12 = vld [vmem:[%s2373_s4 + $0x30] sm:$0xff]  }
  0xf2   : > { %v1595_v13 = vpop.f32.mrf.mxu0 }
  0xf3   : > { %v2119_v13 = vld [vmem:[%s2373_s4 + $0x28] sm:$0xff]  }
  0xfa   : > { %v1859_v14 = vpop.eup %1858 }
  0xfb   : > { %v491_v15 = vpack.c.bf16 %v1859_v14, %v1859_v14  ;;  %v2126_v14 = vld [vmem:[%s2373_s4 + $0x20] sm:$0xff]  }
  0xfd   : > { %1597 = vmatpush3.bf16.xpose.msra.mxu1 %v491_v15  ;;  %v2133_v15 = vld [vmem:[%s2373_s4 + $0x18] sm:$0xff]  }
  0xfe   : > { %1602 = vmatprep.subr.bf16.mxu1 %v1878_v1 }
 0x104   : > { %1599 = vmatmul.mubr.bf16.vlgmr.msra.gmra.mxu1 %v1985_v16 }
 0x105   : > { %1604 = vmatprep.mubr.msk.bf16.mxu1 %vm1879_vm0, %v1878_v1  ;;  %1603 = vmatpush3.bf16.msra.mxu1 %v550_v27  ;;  %v2214_v27 = vld [vmem:[%s2373_s4 + $0x80] sm:$0xff]  }
 0x106   : > { %1608 = vmatprep.subr.bf16.mxu1 %v1878_v1 }
 0x1c4   : > { %v526_v17 = vpop.f32.mrf.mxu1 }
 0x1c5   : > { %v533_v18 = vsel %vm532_vm1, %v526_v17, -inf }
 0x1c6   : > { %534 = vmax.xlane.f32.xlu0 %v533_v18  ;;  %v1600_v19 = vpop.f32.mrf.mxu1  ;;  %v2147_v18 = vld [vmem:[%s2373_s4 + $0x8] sm:$0xff]  }
 0x1c7   : > { %v2154_v19 = vld [vmem:[%s2373_s4] sm:$0xff]  }
 0x1c8   : > { %v529_v20 = vpop.f32.mrf.mxu1 }
 0x1c9   : > { %v2161_v20 = vld [vmem:[%s2373_s4 + $0xb8] sm:$0xff]  }
 0x1ca   : > { %v1601_v21 = vpop.f32.mrf.mxu1 }
 0x1cb   : > { %v2169_v21 = vld [vmem:[%s2373_s4 + $0xb0] sm:$0xff]  }
 0x24f   : > { %v535_v22 = vpop.xlane.xlu0 %534 }
 0x250   : > { %v536_v23 = vsub.f32 %v526_v17, %v535_v22  ;;  %v2140_v17 = vld [vmem:[%s2373_s4 + $0x10] sm:$0xff]   ;;  %v2178_v22 = vld [vmem:[%s2373_s4 + $0xa8] sm:$0xff]  }
 0x252   : > { %v537_v24 = vmul.f32 1.442695, %v536_v23  ;;  %v2185_v23 = vld [vmem:[%s2373_s4 + $0xa0] sm:$0xff]  }
 0x254   : > { %1860 = vpow2.f32 %v537_v24  ;;  %v2192_v24 = vld [vmem:[%s2373_s4 + $0x98] sm:$0xff]  }
 0x261   : > { %v1861_v25 = vpop.eup %1860 }
 0x262   : > { %v539_v26 = vsel %vm532_vm1, %v1861_v25, 0.0 }
 0x263   : > { %540 = vadd.xlane.f32.xlu0 %v539_v26  ;;  %v2206_v26 = vld [vmem:[%s2373_s4 + $0x88] sm:$0xff]  }
 0x2ec   : > { %v541_v28 = vpop.xlane.xlu0 %540 }
 0x2ed   : > { %1862 = vrcp.f32 %v541_v28  ;;  %v780_v28 = vunpack.c.l.bf16 %v1973_v9 }
 0x2fa   : > { %v1863_v29 = vpop.eup %1862 }
 0x2fb   : > { %v543_v30 = vmul.f32 %v1863_v29, %v1861_v25  ;;  %v2199_v25 = vld [vmem:[%s2373_s4 + $0x90] sm:$0xff]  }
 0x2fd   : > { %v544_v32 = vpack.c.bf16 %v543_v30, %v543_v30  ;;  %v2222_v30 = vld [vmem:[%s2373_s4 + $0xf8] sm:$0xff]  }
 0x2ff   : > { %1605 = vmatmul.mubr.msk.bf16.vlgmr.msra.gmra.mxu1 %vm532_vm1, %v544_v32 }
 0x300   : > { %1609 = vmatpush3.bf16.msra.mxu1 %v1818_v31  ;;  %1624 = vmatprep.mubr.msk.bf16.mxu1 %vm1879_vm0, %v1878_v1 }
 0x301   : > { %1610 = vmatprep.subr.bf16.mxu1 %v1878_v1 }
 0x304   : > { %1611 = vmatpush3.bf16.msra.mxu1 %v1819_v33 }
 0x305   : > { %1612 = vmatprep.subr.bf16.mxu1 %v1878_v1 }
 0x308   : > { %1613 = vmatpush3.bf16.msra.mxu1 %v1820_v34 }
 0x309   : > { %1614 = vmatprep.subr.bf16.mxu1 %v1878_v1 }
 0x30c   : > { %1615 = vmatpush3.bf16.msra.mxu1 %v1821_v35 }
 0x30d   : > { %1616 = vmatprep.subr.bf16.mxu1 %v1878_v1 }
 0x310   : > { %1617 = vmatpush3.bf16.msra.mxu1 %v1822_v36  ;;  %v2228_v36 = vld [vmem:[%s2373_s4 + $0xf0] sm:$0xff]  }
 0x311   : > { %1618 = vmatprep.subr.bf16.mxu1 %v1878_v1 }
 0x314   : > { %1619 = vmatpush3.bf16.msra.mxu1 %v1823_v37  ;;  %v2241_v37 = vld [vmem:[%s2373_s4 + $0xe8] sm:$0xff]  }
 0x315   : > { %1620 = vmatprep.subr.bf16.mxu1 %v1878_v1 }
 0x318   : > { %1621 = vmatpush3.bf16.msra.mxu1 %v1824_v38  ;;  %v2250_v38 = vld [vmem:[%s2373_s4 + $0xe0] sm:$0xff]  }
 0x319   : > { %1622 = vmatprep.subr.bf16.mxu1 %v1878_v1 }
 0x31c   : > { %1623 = vmatpush3.bf16.msra.mxu1 %v1825_v39  ;;  %v2259_v39 = vld [vmem:[%s2373_s4 + $0xd8] sm:$0xff]  }
 0x31d   : > { %1660 = vmatprep.subr.bf16.mxu1 %v1878_v1 }
 0x31f   : > { %1625 = vmatmul.mubr.bf16.vlgmr.msra.gmra.mxu1 %v1985_v16 }
 0x320   : > { %1676 = vmatprep.mubr.msk.bf16.mxu1 %vm1879_vm0, %v1878_v1  ;;  %1661 = vmatpush3.bf16.msra.mxu1 %v2047_v61 }
 0x321   : > { %1662 = vmatprep.subr.bf16.mxu1 %v1878_v1 }
 0x324   : > { %1663 = vmatpush3.bf16.msra.mxu1 %v2054_v62 }
 0x325   : > { %1664 = vmatprep.subr.bf16.mxu1 %v1878_v1 }
 0x328   : > { %1665 = vmatpush3.bf16.msra.mxu1 %v2061_v63 }
 0x329   : > { %1666 = vmatprep.subr.bf16.mxu1 %v1878_v1 }
 0x32c   : > { %1667 = vmatpush3.bf16.msra.mxu1 %v2068_v0 }
 0x32d   : > { %1668 = vmatprep.subr.bf16.mxu1 %v1878_v1 }
 0x330   : > { %1669 = vmatpush3.bf16.msra.mxu1 %v2075_v2 }
 0x331   : > { %1670 = vmatprep.subr.bf16.mxu1 %v1878_v1 }
 0x334   : > { %1671 = vmatpush3.bf16.msra.mxu1 %v2082_v3 }
 0x335   : > { %1672 = vmatprep.subr.bf16.mxu1 %v1878_v1 }
 0x338   : > { %1673 = vmatpush3.bf16.msra.mxu1 %v2089_v4 }
 0x339   : > { %1674 = vmatprep.subr.bf16.mxu1 %v1878_v1 }
 0x33c   : > { %1675 = vmatpush3.bf16.msra.mxu1 %v2096_v5 }
 0x33d   : > { %1700 = vmatprep.subr.bf16.mxu1 %v1878_v1 }
 0x3bf   : > { %v2033_v40 = vpop.f32.mrf.mxu1 }
 0x3c1   : > { %v1606_v41 = vpop.f32.mrf.mxu1 }
 0x3c2   : > { %v2268_v41 = vld [vmem:[%s2373_s4 + $0xd0] sm:$0xff]  }
 0x3c3   : > { %v589_v42 = vpop.f32.mrf.mxu1 }
 0x3c4   : > { %v2277_v42 = vld [vmem:[%s2373_s4 + $0xc8] sm:$0xff]  }
 0x3c5   : > { %v1607_v43 = vpop.f32.mrf.mxu1 }
 0x3c6   : > { %v2286_v43 = vld [vmem:[%s2373_s4 + $0xc0] sm:$0xff]  }
 0x3df   : > { %v674_v44 = vpop.f32.mrf.mxu1 }
 0x3e0   : > { %1864 = vtanh.f32 %v674_v44 }
 0x3e1   : > { %v1626_v45 = vpop.f32.mrf.mxu1 }
 0x3e3   : > { %v677_v46 = vpop.f32.mrf.mxu1 }
 0x3e5   : > { %v1627_v47 = vpop.f32.mrf.mxu1 }
 0x3ed   : > { %v1865_v48 = vpop.eup %1864 }
 0x3ee   : > { %v681_v49 = vpack.c.bf16 %v1865_v48, %v1865_v48 }
 0x3f0   : > { %1629 = vmatpush3.bf16.xpose.msra.mxu0 %v681_v49 }
 0x3f1   : > { %1634 = vmatprep.subr.bf16.mxu0 %v1878_v1 }
 0x3f7   : > { %1631 = vmatmul.mubr.bf16.vlgmr.msra.gmra.mxu0 %v1973_v9 }
 0x3f8   : > { %1636 = vmatprep.mubr.msk.bf16.mxu0 %vm1879_vm0, %v1878_v1  ;;  %1635 = vmatpush3.bf16.msra.mxu0 %v738_v60 }
 0x3f9   : > { %1640 = vmatprep.subr.bf16.mxu0 %v1878_v1 }
 0x4b7   : > { %v716_v50 = vpop.f32.mrf.mxu0 }
 0x4b8   : > { %v722_v51 = vsel %vm532_vm1, %v716_v50, -inf }
 0x4b9   : > { %723 = vmax.xlane.f32.xlu1 %v722_v51  ;;  %v1632_v52 = vpop.f32.mrf.mxu0 }
 0x4ba   : > { %v1150_v52 = vpack.c.bf16 %v2033_v40, %v2033_v40 }
 0x4bb   : > { %v719_v53 = vpop.f32.mrf.mxu0 }
 0x4bd   : > { %v1633_v54 = vpop.f32.mrf.mxu0 }
 0x542   : > { %v724_v55 = vpop.xlane.xlu1 %723 }
 0x543   : > { %v725_v56 = vsub.f32 %v716_v50, %v724_v55  ;;  %v1149_v50 = vunpack.c.l.bf16 %v1985_v16 }
 0x545   : > { %v726_v57 = vmul.f32 1.442695, %v725_v56  ;;  %v1233_v51 = vsub.f32 %v1149_v50, %v2033_v40  ;;  %v1276_v53 = vmul.f32 %v1149_v50, %v2033_v40 }
 0x547   : > { %1866 = vpow2.f32 %v726_v57  ;;  %v1277_v54 = vpack.c.bf16 %v1276_v53, %v1276_v53 }
 0x554   : > { %v1867_v58 = vpop.eup %1866 }
 0x555   : > { %v728_v59 = vsel %vm532_vm1, %v1867_v58, 0.0 }
 0x556   : > { %729 = vadd.xlane.f32.xlu1 %v728_v59 }
 0x5df   : > { %v730_v6 = vpop.xlane.xlu1 %729 }
 0x5e0   : > { %1868 = vrcp.f32 %v730_v6 }
 0x5ed   : > { %v1869_v7 = vpop.eup %1868 }
 0x5ee   : > { %v732_v8 = vmul.f32 %v1869_v7, %v1867_v58 }
 0x5f0   : > { %v733_v11 = vpack.c.bf16 %v732_v8, %v732_v8 }
 0x5f2   : > { %1637 = vmatmul.mubr.msk.bf16.vlgmr.msra.gmra.mxu0 %vm532_vm1, %v733_v11 }
 0x5f3   : > { %1641 = vmatpush3.bf16.msra.mxu0 %v2103_v10  ;;  %1656 = vmatprep.mubr.msk.bf16.mxu0 %vm1879_vm0, %v1878_v1 }
 0x5f4   : > { %1642 = vmatprep.subr.bf16.mxu0 %v1878_v1 }
 0x5f7   : > { %1643 = vmatpush3.bf16.msra.mxu0 %v2110_v12 }
 0x5f8   : > { %1644 = vmatprep.subr.bf16.mxu0 %v1878_v1 }
 0x5fb   : > { %1645 = vmatpush3.bf16.msra.mxu0 %v2119_v13 }
 0x5fc   : > { %1646 = vmatprep.subr.bf16.mxu0 %v1878_v1 }
 0x5ff   : > { %1647 = vmatpush3.bf16.msra.mxu0 %v2126_v14 }
 0x600   : > { %1648 = vmatprep.subr.bf16.mxu0 %v1878_v1 }
 0x603   : > { %1649 = vmatpush3.bf16.msra.mxu0 %v2133_v15 }
 0x604   : > { %1650 = vmatprep.subr.bf16.mxu0 %v1878_v1 }
 0x607   : > { %1651 = vmatpush3.bf16.msra.mxu0 %v2140_v17 }
 0x608   : > { %1652 = vmatprep.subr.bf16.mxu0 %v1878_v1 }
 0x60b   : > { %1653 = vmatpush3.bf16.msra.mxu0 %v2147_v18 }
 0x60c   : > { %1654 = vmatprep.subr.bf16.mxu0 %v1878_v1 }
 0x60f   : > { %1655 = vmatpush3.bf16.msra.mxu0 %v2154_v19 }
 0x610   : > { %1680 = vmatprep.subr.bf16.mxu0 %v1878_v1 }
 0x612   : > { %1657 = vmatmul.mubr.bf16.vlgmr.msra.gmra.mxu0 %v1973_v9 }
 0x613   : > { %1681 = vmatpush3.bf16.msra.mxu0 %v2161_v20  ;;  %1696 = vmatprep.mubr.msk.bf16.mxu0 %vm1879_vm0, %v1878_v1 }
 0x614   : > { %1682 = vmatprep.subr.bf16.mxu0 %v1878_v1 }
 0x617   : > { %1683 = vmatpush3.bf16.msra.mxu0 %v2169_v21 }
 0x618   : > { %1684 = vmatprep.subr.bf16.mxu0 %v1878_v1 }
 0x61b   : > { %1685 = vmatpush3.bf16.msra.mxu0 %v2178_v22 }
 0x61c   : > { %1686 = vmatprep.subr.bf16.mxu0 %v1878_v1 }
 0x61f   : > { %1687 = vmatpush3.bf16.msra.mxu0 %v2185_v23 }
 0x620   : > { %1688 = vmatprep.subr.bf16.mxu0 %v1878_v1 }
 0x623   : > { %1689 = vmatpush3.bf16.msra.mxu0 %v2192_v24 }
 0x624   : > { %1690 = vmatprep.subr.bf16.mxu0 %v1878_v1 }
 0x627   : > { %1691 = vmatpush3.bf16.msra.mxu0 %v2199_v25 }
 0x628   : > { %1692 = vmatprep.subr.bf16.mxu0 %v1878_v1 }
 0x62b   : > { %1693 = vmatpush3.bf16.msra.mxu0 %v2206_v26 }
 0x62c   : > { %1694 = vmatprep.subr.bf16.mxu0 %v1878_v1 }
 0x62f   : > { %1695 = vmatpush3.bf16.msra.mxu0 %v2214_v27 }
 0x630   : > { %1720 = vmatprep.subr.bf16.mxu0 %v1878_v1 }
 0x6b2   : > { %v774_v29 = vpop.f32.mrf.mxu0 }
 0x6b3   : > { %v781_v31 = vpack.c.bf16 %v774_v29, %v774_v29  ;;  %v966_v32 = vsub.f32 %v780_v28, %v774_v29  ;;  %v1057_v44 = vmul.f32 %v780_v28, %v774_v29 }
 0x6b4   : > { %v1638_v33 = vpop.f32.mrf.mxu0 }
 0x6b5   : > { %v967_v34 = vpack.c.bf16 %v966_v32, %v966_v32  ;;  %1677 = vmatmul.mubr.bf16.vlgmr.msra.gmra.mxu1 %v781_v31  ;;  %v1058_v46 = vpack.c.bf16 %v1057_v44, %v1057_v44 }
 0x6b6   : > { %1701 = vmatpush3.bf16.msra.mxu1 %v2222_v30  ;;  %v777_v35 = vpop.f32.mrf.mxu0  ;;  %1716 = vmatprep.mubr.msk.bf16.mxu1 %vm1879_vm0, %v1878_v1 }
 0x6b7   : > { %1697 = vmatmul.mubr.bf16.vlgmr.msra.gmra.mxu0 %v967_v34  ;;  %1702 = vmatprep.subr.bf16.mxu1 %v1878_v1 }
 0x6b8   : > { %1721 = vmatpush3.bf16.msra.mxu0 %v2103_v10  ;;  %v1639_v9 = vpop.f32.mrf.mxu0  ;;  %1736 = vmatprep.mubr.msk.bf16.mxu0 %vm1879_vm0, %v1878_v1 }
 0x6b9   : > { %1722 = vmatprep.subr.bf16.mxu0 %v1878_v1 }
 0x6ba   : > { %1703 = vmatpush3.bf16.msra.mxu1 %v2228_v36 }
 0x6bb   : > { %1704 = vmatprep.subr.bf16.mxu1 %v1878_v1 }
 0x6bc   : > { %1723 = vmatpush3.bf16.msra.mxu0 %v2110_v12 }
 0x6bd   : > { %1724 = vmatprep.subr.bf16.mxu0 %v1878_v1 }
 0x6be   : > { %1705 = vmatpush3.bf16.msra.mxu1 %v2241_v37 }
 0x6bf   : > { %1706 = vmatprep.subr.bf16.mxu1 %v1878_v1 }
 0x6c0   : > { %1725 = vmatpush3.bf16.msra.mxu0 %v2119_v13 }
 0x6c1   : > { %1726 = vmatprep.subr.bf16.mxu0 %v1878_v1 }
 0x6c2   : > { %1707 = vmatpush3.bf16.msra.mxu1 %v2250_v38 }
 0x6c3   : > { %1708 = vmatprep.subr.bf16.mxu1 %v1878_v1 }
 0x6c4   : > { %1727 = vmatpush3.bf16.msra.mxu0 %v2126_v14 }
 0x6c5   : > { %1728 = vmatprep.subr.bf16.mxu0 %v1878_v1 }
 0x6c6   : > { %1709 = vmatpush3.bf16.msra.mxu1 %v2259_v39 }
 0x6c7   : > { %1710 = vmatprep.subr.bf16.mxu1 %v1878_v1 }
 0x6c8   : > { %1729 = vmatpush3.bf16.msra.mxu0 %v2133_v15 }
 0x6c9   : > { %1730 = vmatprep.subr.bf16.mxu0 %v1878_v1 }
 0x6ca   : > { %1711 = vmatpush3.bf16.msra.mxu1 %v2268_v41 }
 0x6cb   : > { %1712 = vmatprep.subr.bf16.mxu1 %v1878_v1 }
 0x6cc   : > { %1731 = vmatpush3.bf16.msra.mxu0 %v2140_v17 }
 0x6cd   : > { %1732 = vmatprep.subr.bf16.mxu0 %v1878_v1 }
 0x6ce   : > { %1713 = vmatpush3.bf16.msra.mxu1 %v2277_v42 }
 0x6cf   : > { %1714 = vmatprep.subr.bf16.mxu1 %v1878_v1 }
 0x6d0   : > { %1733 = vmatpush3.bf16.msra.mxu0 %v2147_v18 }
 0x6d1   : > { %1734 = vmatprep.subr.bf16.mxu0 %v1878_v1 }
 0x6d2   : > { %1715 = vmatpush3.bf16.msra.mxu1 %v2286_v43  ;;  %v2292_v45 = vpop.f32.mrf.mxu0 }
 0x6d3   : > { %1740 = vmatprep.subr.bf16.mxu1 %v1878_v1 }
 0x6d4   : > { %1735 = vmatpush3.bf16.msra.mxu0 %v2154_v19  ;;  %v1658_v47 = vpop.f32.mrf.mxu0 }
 0x6d5   : > { %1717 = vmatmul.mubr.bf16.vlgmr.msra.gmra.mxu1 %v1058_v46  ;;  %1760 = vmatprep.subr.bf16.mxu0 %v1878_v1 }
 0x6d6   : > { %1741 = vmatpush3.bf16.msra.mxu1 %v2047_v61  ;;  %1756 = vmatprep.mubr.msk.bf16.mxu1 %vm1879_vm0, %v1878_v1  ;;  %v867_v48 = vpop.f32.mrf.mxu0 }
 0x6d7   : > { %1737 = vmatmul.mubr.bf16.vlgmr.msra.gmra.mxu0 %v1985_v16  ;;  %1742 = vmatprep.subr.bf16.mxu1 %v1878_v1  ;;  %v1234_v16 = vpack.c.bf16 %v1233_v51, %v1233_v51 }
 0x6d8   : > { %1761 = vmatpush3.bf16.msra.mxu0 %v2161_v20  ;;  %1776 = vmatprep.mubr.msk.bf16.mxu0 %vm1879_vm0, %v1878_v1  ;;  %v1659_v49 = vpop.f32.mrf.mxu0 }
 0x6d9   : > { %1762 = vmatprep.subr.bf16.mxu0 %v1878_v1 }
 0x6da   : > { %1743 = vmatpush3.bf16.msra.mxu1 %v2054_v62 }
 0x6db   : > { %1744 = vmatprep.subr.bf16.mxu1 %v1878_v1 }
 0x6dc   : > { %1763 = vmatpush3.bf16.msra.mxu0 %v2169_v21 }
 0x6dd   : > { %1764 = vmatprep.subr.bf16.mxu0 %v1878_v1 }
 0x6de   : > { %1745 = vmatpush3.bf16.msra.mxu1 %v2061_v63  ;;  %v1451_v63 = vld [vmem:[%s2374_s5] ss:$0 sm:$0xff] }
 0x6df   : > { %1746 = vmatprep.subr.bf16.mxu1 %v1878_v1  ;;  %v876_v40 = vadd.f32 %v1451_v63, %v2292_v45 }
 0x6e0   : > { %1765 = vmatpush3.bf16.msra.mxu0 %v2178_v22 }
 0x6e1   : > { %1766 = vmatprep.subr.bf16.mxu0 %v1878_v1 }
 0x6e2   : > { %1747 = vmatpush3.bf16.msra.mxu1 %v2068_v0 }
 0x6e3   : > { %1748 = vmatprep.subr.bf16.mxu1 %v1878_v1 }
 0x6e4   : > { %1767 = vmatpush3.bf16.msra.mxu0 %v2185_v23 }
 0x6e5   : > { %1768 = vmatprep.subr.bf16.mxu0 %v1878_v1 }
 0x6e6   : > { %1749 = vmatpush3.bf16.msra.mxu1 %v2075_v2 }
 0x6e7   : > { %1750 = vmatprep.subr.bf16.mxu1 %v1878_v1 }
 0x6e8   : > { %1769 = vmatpush3.bf16.msra.mxu0 %v2192_v24 }
 0x6e9   : > { %1770 = vmatprep.subr.bf16.mxu0 %v1878_v1 }
 0x6ea   : > { %1751 = vmatpush3.bf16.msra.mxu1 %v2082_v3 }
 0x6eb   : > { %1752 = vmatprep.subr.bf16.mxu1 %v1878_v1 }
 0x6ec   : > { %1771 = vmatpush3.bf16.msra.mxu0 %v2199_v25 }
 0x6ed   : > { %1772 = vmatprep.subr.bf16.mxu0 %v1878_v1 }
 0x6ee   : > { %1753 = vmatpush3.bf16.msra.mxu1 %v2089_v4 }
 0x6ef   : > { %1754 = vmatprep.subr.bf16.mxu1 %v1878_v1 }
 0x6f0   : > { %1773 = vmatpush3.bf16.msra.mxu0 %v2206_v26 }
 0x6f1   : > { %1774 = vmatprep.subr.bf16.mxu0 %v1878_v1 }
 0x6f2   : > { %1755 = vmatpush3.bf16.msra.mxu1 %v2096_v5 }
 0x6f3   : > { %1780 = vmatprep.subr.bf16.mxu1 %v1878_v1 }
 0x6f4   : > { %1775 = vmatpush3.bf16.msra.mxu0 %v2214_v27 }
 0x6f5   : > { %1757 = vmatmul.mubr.bf16.vlgmr.msra.gmra.mxu1 %v1150_v52 }
 0x6f6   : > { %1781 = vmatpush3.bf16.msra.mxu1 %v2222_v30  ;;  %1796 = vmatprep.mubr.msk.bf16.mxu1 %vm1879_vm0, %v1878_v1 }
 0x6f7   : > { %1777 = vmatmul.mubr.bf16.vlgmr.msra.gmra.mxu0 %v1234_v16  ;;  %1782 = vmatprep.subr.bf16.mxu1 %v1878_v1 }
 0x6fa   : > { %1783 = vmatpush3.bf16.msra.mxu1 %v2228_v36 }
 0x6fb   : > { %1784 = vmatprep.subr.bf16.mxu1 %v1878_v1 }
 0x6fe   : > { %1785 = vmatpush3.bf16.msra.mxu1 %v2241_v37 }
 0x6ff   : > { %1786 = vmatprep.subr.bf16.mxu1 %v1878_v1 }
 0x702   : > { %1787 = vmatpush3.bf16.msra.mxu1 %v2250_v38 }
 0x703   : > { %1788 = vmatprep.subr.bf16.mxu1 %v1878_v1 }
 0x706   : > { %1789 = vmatpush3.bf16.msra.mxu1 %v2259_v39 }
 0x707   : > { %1790 = vmatprep.subr.bf16.mxu1 %v1878_v1 }
 0x70a   : > { %1791 = vmatpush3.bf16.msra.mxu1 %v2268_v41 }
 0x70b   : > { %1792 = vmatprep.subr.bf16.mxu1 %v1878_v1 }
 0x70e   : > { %1793 = vmatpush3.bf16.msra.mxu1 %v2277_v42 }
 0x70f   : > { %1794 = vmatprep.subr.bf16.mxu1 %v1878_v1 }
 0x712   : > { %1795 = vmatpush3.bf16.msra.mxu1 %v2286_v43 }
 0x715   : > { %1797 = vmatmul.mubr.bf16.vlgmr.msra.gmra.mxu1 %v1277_v54 }
 0x775   : > { %v959_v55 = vpop.f32.mrf.mxu1 }
 0x776   : > { %v965_v0 = vadd.f32 %v959_v55, %v876_v40 }
 0x777   : > { %v1678_v56 = vpop.f32.mrf.mxu1  ;;  %v1050_v57 = vpop.f32.mrf.mxu0 }
 0x778   : > { %v1056_v1 = vadd.f32 %v1050_v57, %v965_v0 }
 0x779   : > { %v962_v58 = vpop.f32.mrf.mxu1  ;;  %v1698_v59 = vpop.f32.mrf.mxu0 }
 0x77b   : > { %v1679_v60 = vpop.f32.mrf.mxu1  ;;  %v1053_v61 = vpop.f32.mrf.mxu0 }
 0x77d   : > { %v1699_v62 = vpop.f32.mrf.mxu0 }
 0x795   : > { %v1141_v2 = vpop.f32.mrf.mxu1 }
 0x796   : > { %v1147_v3 = vadd.f32 %v1141_v2, %v1056_v1 }
 0x797   : > { %v1718_v4 = vpop.f32.mrf.mxu1  ;;  %v1185_v5 = vpop.f32.mrf.mxu0 }
 0x798   : > { %1148 = vst [vmem:[%s297_s29] sm:$0xff] %v1147_v3  ;;  %v1191_v21 = vadd.f32 %v1451_v63, %v1185_v5 }
 0x799   : > { %v1144_v6 = vpop.f32.mrf.mxu1  ;;  %v1738_v7 = vpop.f32.mrf.mxu0 }
 0x79b   : > { %v1719_v8 = vpop.f32.mrf.mxu1  ;;  %v1188_v10 = vpop.f32.mrf.mxu0 }
 0x79d   : > { %v1739_v11 = vpop.f32.mrf.mxu0 }
 0x7b5   : > { %v1226_v12 = vpop.f32.mrf.mxu1 }
 0x7b6   : > { %v1232_v22 = vadd.f32 %v1226_v12, %v1191_v21 }
 0x7b7   : > { %v1758_v13 = vpop.f32.mrf.mxu1  ;;  %v1269_v14 = vpop.f32.mrf.mxu0 }
 0x7b8   : > { %v1275_v23 = vadd.f32 %v1269_v14, %v1232_v22 }
 0x7b9   : > { %v1229_v15 = vpop.f32.mrf.mxu1  ;;  %v1778_v17 = vpop.f32.mrf.mxu0 }
 0x7bb   : > { %v1759_v18 = vpop.f32.mrf.mxu1  ;;  %v1272_v19 = vpop.f32.mrf.mxu0 }
 0x7bd   : > { %v1779_v20 = vpop.f32.mrf.mxu0 }
 0x7d5   : > { %v1312_v24 = vpop.f32.mrf.mxu1 }
 0x7d6   : > { %v1318_v25 = vadd.f32 %v1312_v24, %v1275_v23 }
 0x7d7   : > { %v1798_v26 = vpop.f32.mrf.mxu1 }
 0x7d8   : > { %1319 = vst [vmem:[%s301_s8] sm:$0xff] %v1318_v25 }
 0x7d9   : > { %v1315_v27 = vpop.f32.mrf.mxu1 }
 0x7db   : > { %v1799_v28 = vpop.f32.mrf.mxu1 }
 0x7dc PF: > { %s18_s24 = sadd.s32 1, %s1876_s24  }
 0x7dd   : > { %p15_p4 = scmp.ge.s32.totalorder %s18_s24, 4  }
 0x7df   :  { %17 = sbr.rel (!%p15_p4) target bundleno = 1 (0x1), region = 89 }

</bundles_post_ra>
